<compile_context>
chip_gen: v5e
topology: v5e:2x2
jax: 0.10.0
libtpu: 0.0.40
codegen_flags: <defaults>
</compile_context>

<pallas_src>
import jax
import jax.numpy as jnp
from jax.experimental import pallas as pl
from jax.experimental.pallas import tpu as pltpu


def _round_up(x, m):
    return (x + m - 1) // m * m


def _cdiv(a, b):
    return (a + b - 1) // b


# ---------------------------------------------------------------------------
# Kernels
# ---------------------------------------------------------------------------
def _ffn_kernel_resident(x_ref, w1_ref, b1_ref, w2_ref, b2_ref, o_ref):
    """Weights fully resident in VMEM: 1-D grid over row tiles, no scratch."""
    h = jnp.dot(x_ref[...], w1_ref[...], preferred_element_type=jnp.float32)
    h = jnp.maximum(h + b1_ref[...].astype(jnp.float32), 0.0)
    h = h.astype(w2_ref.dtype)                       # MXU dtype for 2nd matmul
    out = jnp.dot(h, w2_ref[...], preferred_element_type=jnp.float32)
    o_ref[...] = (out + b2_ref[...].astype(jnp.float32)).astype(o_ref.dtype)


def _ffn_kernel_streamed(x_ref, w1_ref, b1_ref, w2_ref, b2_ref, o_ref, acc_ref):
    """d_ff streamed in slices; reduction axis is grid axis 1 (innermost)."""
    k = pl.program_id(1)

    @pl.when(k == 0)
    def _():
        acc_ref[...] = jnp.zeros_like(acc_ref)

    h = jnp.dot(x_ref[...], w1_ref[...], preferred_element_type=jnp.float32)
    h = jnp.maximum(h + b1_ref[...].astype(jnp.float32), 0.0)
    h = h.astype(w2_ref.dtype)
    acc_ref[...] += jnp.dot(h, w2_ref[...], preferred_element_type=jnp.float32)

    @pl.when(k == pl.num_programs(1) - 1)
    def _():
        o_ref[...] = (acc_ref[...] + b2_ref[...].astype(jnp.float32)).astype(o_ref.dtype)


# ---------------------------------------------------------------------------
# VMEM-aware tile planning
# ---------------------------------------------------------------------------
def _vmem_capacity_bytes():
    try:
        return int(pltpu.get_tpu_info().vmem_capacity_bytes)
    except Exception:
        return 64 << 20        # conservative default (v7x per-TensorCore VMEM)


def _plan_tiles(n, d_model, d_ff, dtype_bytes):
    """Return (mode, tile_m, tile_ff, vmem_need_bytes, vmem_capacity_bytes)."""
    capacity = _vmem_capacity_bytes()
    budget = int(capacity * 0.70)                    # headroom for Mosaic temporaries
    packing = max(1, 4 // dtype_bytes) * 8           # sublane packing (8 f32 / 16 bf16)
    weight_bytes = (2 * d_model * d_ff + d_ff + d_model) * dtype_bytes

    def fit_m(tm):
        tm = min(tm, _round_up(n, packing))
        return max(packing, _round_up(tm, packing))

    def resident_need(tm):
        return (2 * weight_bytes                      # W1/b1/W2/b2 (double-buffered)
                + 4 * tm * d_model * dtype_bytes      # x + out row tiles (double-buffered)
                + tm * d_ff * (4 + dtype_bytes)       # f32 hidden + MXU-dtype copy
                + tm * d_model * 4)                   # f32 result of 2nd matmul

    def streamed_need(tm, tff):
        return (4 * tm * d_model * dtype_bytes            # x + out row tiles
                + 2 * (d_model + 8) * tff * dtype_bytes   # W1 + b1 slices (double-buffered)
                + 2 * (tff + 8) * d_model * dtype_bytes   # W2 slice + b2 (double-buffered)
                + tm * d_model * 4                        # f32 accumulator scratch
                + tm * tff * (4 + dtype_bytes)            # f32 hidden + MXU-dtype copy
                + tm * d_model * 4)                       # f32 partial of 2nd matmul

    # Preferred: full weights resident so they are fetched from HBM exactly once.
    for tm in (1024, 512, 256, 128):
        tm_e = fit_m(tm)
        if resident_need(tm_e) <= budget:
            return "resident", tm_e, d_ff, resident_need(tm_e), capacity

    # Fallback: stream d_ff in slices.  Large tile_m first: HBM weight traffic
    # scales with the number of row tiles, so amortize it as hard as possible.
    for tm, tff in ((1024, 1024), (1024, 512), (512, 1024), (512, 512),
                    (256, 512), (256, 256), (128, 256), (128, 128)):
        tm_e = fit_m(tm)
        tff_e = min(tff, _round_up(d_ff, 128))
        if streamed_need(tm_e, tff_e) <= budget:
            return "streamed", tm_e, tff_e, streamed_need(tm_e, tff_e), capacity

    tm_e, tff_e = fit_m(128), min(128, _round_up(d_ff, 128))
    return "streamed", tm_e, tff_e, streamed_need(tm_e, tff_e), capacity


# ---------------------------------------------------------------------------
# Wrapper
# ---------------------------------------------------------------------------
@jax.jit
def position_wise_ffn(x, w1, b1, w2, b2):
    """relu(x @ w1 + b1) @ w2 + b2 applied along the last dim of x.

    x : (..., d_model)
    w1: (d_model, d_ff)   b1: (d_ff,) or (1, d_ff)
    w2: (d_ff, d_model)   b2: (d_model,) or (1, d_model)
    """
    orig_shape = x.shape
    d_model = orig_shape[-1]
    d_ff = w1.shape[1]
    x2d = x.reshape(-1, d_model)
    n = x2d.shape[0]
    b1 = b1.reshape(1, d_ff)
    b2 = b2.reshape(1, d_model)
    dtype_bytes = jnp.dtype(x.dtype).itemsize

    mode, tile_m, tile_ff, vmem_need, capacity = _plan_tiles(
        n, d_model, d_ff, dtype_bytes)

    # Ensure >= 2 row tiles (grid axis 0 is "parallel") so both TensorCores of
    # multi-core parts (v7x) get work even for small N.
    packing = max(1, 4 // dtype_bytes) * 8
    if _cdiv(n, tile_m) < 2 and n > packing:
        half = max(packing, _round_up(_cdiv(n, 2), packing))
        if half < tile_m:
            tile_m = half

    n_pad = _round_up(n, tile_m)
    if n_pad != n:
        x2d = jnp.pad(x2d, ((0, n_pad - n), (0, 0)))
    num_row_tiles = n_pad // tile_m

    # Never clamp the scoped VMEM limit below what the chosen tiles need.
    vmem_limit = int(min(capacity, max(vmem_need + (8 << 20), 32 << 20)))

    if mode == "resident":
        grid = (num_row_tiles,)
        in_specs = [
            pl.BlockSpec((tile_m, d_model), lambda i: (i, 0)),   # x row tile
            pl.BlockSpec((d_model, d_ff), lambda i: (0, 0)),     # W1 (resident)
            pl.BlockSpec((1, d_ff), lambda i: (0, 0)),           # b1 (resident)
            pl.BlockSpec((d_ff, d_model), lambda i: (0, 0)),     # W2 (resident)
            pl.BlockSpec((1, d_model), lambda i: (0, 0)),        # b2 (resident)
        ]
        out_specs = pl.BlockSpec((tile_m, d_model), lambda i: (i, 0))
        scratch_shapes = []
        kernel = _ffn_kernel_resident
        dim_sem = ("parallel",)
        weight_hbm_reads = 1
        ff_total = d_ff
    else:
        ff_pad = _round_up(d_ff, tile_ff)
        if ff_pad != d_ff:
            w1 = jnp.pad(w1, ((0, 0), (0, ff_pad - d_ff)))
            b1 = jnp.pad(b1, ((0, 0), (0, ff_pad - d_ff)))
            w2 = jnp.pad(w2, ((0, ff_pad - d_ff), (0, 0)))
        grid = (num_row_tiles, ff_pad // tile_ff)
        in_specs = [
            pl.BlockSpec((tile_m, d_model), lambda i, k: (i, 0)),    # x row tile
            pl.BlockSpec((d_model, tile_ff), lambda i, k: (0, k)),   # W1 d_ff-slice
            pl.BlockSpec((1, tile_ff), lambda i, k: (0, k)),         # b1 slice
            pl.BlockSpec((tile_ff, d_model), lambda i, k: (k, 0)),   # W2 d_ff-slice
            pl.BlockSpec((1, d_model), lambda i, k: (0, 0)),         # b2
        ]
        out_specs = pl.BlockSpec((tile_m, d_model), lambda i, k: (i, 0))
        scratch_shapes = [pltpu.VMEM((tile_m, d_model), jnp.float32)]
        kernel = _ffn_kernel_streamed
        dim_sem = ("parallel", "arbitrary")
        weight_hbm_reads = num_row_tiles        # weights re-streamed per row tile
        ff_total = ff_pad

    weight_bytes_total = (w1.size + b1.size + w2.size + b2.size) * dtype_bytes
    cost = pl.CostEstimate(
        flops=4 * n_pad * d_model * ff_total,            # two matmuls
        transcendentals=0,
        bytes_accessed=int(x2d.size * dtype_bytes
                           + weight_bytes_total * weight_hbm_reads
                           + n_pad * d_model * dtype_bytes),
    )

    out = pl.pallas_call(
        kernel,
        out_shape=jax.ShapeDtypeStruct((n_pad, d_model), x.dtype),
        grid_spec=pltpu.PrefetchScalarGridSpec(
            num_scalar_prefetch=0,
            grid=grid,
            in_specs=in_specs,
            out_specs=out_specs,
            scratch_shapes=scratch_shapes,
        ),
        compiler_params=pltpu.CompilerParams(
            dimension_semantics=dim_sem,
            vmem_limit_bytes=vmem_limit,
        ),
        cost_estimate=cost,
    )(x2d, w1, b1, w2, b2)

    return out[:n].reshape(orig_shape)


def init_params(key, d_model, d_ff, dtype=jnp.float32):
    """Deterministic init mimicking nn.Linear default (uniform +- 1/sqrt(fan_in))."""
    k1, k2, k3, k4 = jax.random.split(key, 4)
    bound1 = 1.0 / (d_model ** 0.5)
    bound2 = 1.0 / (d_ff ** 0.5)
    # nn.Linear stores weight as (out, in); we keep the transposed (in, out) layout.
    w1 = jax.random.uniform(k1, (d_model, d_ff), dtype, -bound1, bound1)
    b1 = jax.random.uniform(k2, (1, d_ff), dtype, -bound1, bound1)
    w2 = jax.random.uniform(k3, (d_ff, d_model), dtype, -bound2, bound2)
    b2 = jax.random.uniform(k4, (1, d_model), dtype, -bound2, bound2)
    return w1, b1, w2, b2


if __name__ == "__main__":
    batch, seq, d_model, d_ff = 2, 8, 32, 64
    key = jax.random.PRNGKey(0)
    kx, kp = jax.random.split(key)

    x = jax.random.normal(kx, (batch, seq, d_model), jnp.float32)
    w1, b1, w2, b2 = init_params(kp, d_model, d_ff)

    out = position_wise_ffn(x, w1, b1, w2, b2)
    jax.block_until_ready(out)

    # Pure-JAX reference (f32 path -> tight tolerance).  For bf16 inputs the
    # kernel's mixed-precision second matmul would require a looser tolerance.
    ref = jnp.maximum(x @ w1 + b1, 0.0) @ w2 + b2
    assert out.shape == x.shape
    assert jnp.allclose(out, ref, atol=1e-5, rtol=1e-5), "mismatch vs reference"

    print("KERNEL_OK")
</pallas_src>

<mosaic_0001>
module attributes {stable_mosaic.version = 11 : i64} {
  func.func @_ffn_kernel_resident(%arg0: i32, %arg1: memref<8x32xf32, #tpu.memory_space<vmem>>, %arg2: memref<32x64xf32, #tpu.memory_space<vmem>>, %arg3: memref<1x64xf32, #tpu.memory_space<vmem>>, %arg4: memref<64x32xf32, #tpu.memory_space<vmem>>, %arg5: memref<1x32xf32, #tpu.memory_space<vmem>>, %arg6: memref<8x32xf32, #tpu.memory_space<vmem>>) attributes {dimension_semantics = [#tpu.dimension_semantics<parallel>], iteration_bounds = array<i64: 2>, scalar_prefetch = 0 : i64, scratch_operands = 0 : i64, tpu.core_type = #tpu.core_type<tc>, window_params = [{transform_indices = @transform_0, window_bounds = array<i64: 8, 32>}, {pipeline_mode = #tpu.pipeline_mode<synchronous>, transform_indices = @transform_1, window_bounds = array<i64: 32, 64>}, {pipeline_mode = #tpu.pipeline_mode<synchronous>, transform_indices = @transform_2, window_bounds = array<i64: 1, 64>}, {pipeline_mode = #tpu.pipeline_mode<synchronous>, transform_indices = @transform_3, window_bounds = array<i64: 64, 32>}, {pipeline_mode = #tpu.pipeline_mode<synchronous>, transform_indices = @transform_4, window_bounds = array<i64: 1, 32>}, {transform_indices = @transform_5, window_bounds = array<i64: 8, 32>}]} {
    %c0 = arith.constant 0 : index
    %c0_0 = arith.constant 0 : index
    %0 = vector.load %arg1[%c0, %c0_0] : memref<8x32xf32, #tpu.memory_space<vmem>>, vector<8x32xf32>
    %c0_1 = arith.constant 0 : index
    %c0_2 = arith.constant 0 : index
    %1 = vector.load %arg2[%c0_1, %c0_2] : memref<32x64xf32, #tpu.memory_space<vmem>>, vector<32x64xf32>
    %cst = arith.constant dense<0.000000e+00> : vector<8x64xf32>
    %2 = tpu.matmul %0, %1, %cst {dimension_numbers = #tpu.dot_dimension_numbers<[1], [0], [0], [1], [0, 0, 1, 1], [], []>} : vector<8x32xf32>, vector<32x64xf32>, vector<8x64xf32> -> vector<8x64xf32>
    %c0_3 = arith.constant 0 : index
    %c0_4 = arith.constant 0 : index
    %3 = vector.load %arg3[%c0_3, %c0_4] : memref<1x64xf32, #tpu.memory_space<vmem>>, vector<1x64xf32>
    %4 = vector.broadcast %3 : vector<1x64xf32> to vector<8x64xf32>
    %5 = arith.addf %2, %4 : vector<8x64xf32>
    %cst_5 = arith.constant 0.000000e+00 : f32
    %6 = vector.broadcast %cst_5 : f32 to vector<8x64xf32>
    %7 = arith.maximumf %5, %6 : vector<8x64xf32>
    %c0_6 = arith.constant 0 : index
    %c0_7 = arith.constant 0 : index
    %8 = vector.load %arg4[%c0_6, %c0_7] : memref<64x32xf32, #tpu.memory_space<vmem>>, vector<64x32xf32>
    %cst_8 = arith.constant dense<0.000000e+00> : vector<8x32xf32>
    %9 = tpu.matmul %7, %8, %cst_8 {dimension_numbers = #tpu.dot_dimension_numbers<[1], [0], [0], [1], [0, 0, 1, 1], [], []>} : vector<8x64xf32>, vector<64x32xf32>, vector<8x32xf32> -> vector<8x32xf32>
    %c0_9 = arith.constant 0 : index
    %c0_10 = arith.constant 0 : index
    %10 = vector.load %arg5[%c0_9, %c0_10] : memref<1x32xf32, #tpu.memory_space<vmem>>, vector<1x32xf32>
    %11 = vector.broadcast %10 : vector<1x32xf32> to vector<8x32xf32>
    %12 = arith.addf %9, %11 : vector<8x32xf32>
    %c0_11 = arith.constant 0 : index
    %c0_12 = arith.constant 0 : index
    %13 = vector.load %arg6[%c0_11, %c0_12] : memref<8x32xf32, #tpu.memory_space<vmem>>, vector<8x32xf32>
    tpu.vector_store %arg6[%c0_11, %c0_12], %12 {strides = array<i32>} : memref<8x32xf32, #tpu.memory_space<vmem>>, vector<8x32xf32>,
    return
  }
  func.func @transform_0(%arg0: i32) -> (i32, i32) {
    %c0_i32 = arith.constant 0 : i32
    %c0_i32_0 = arith.constant 0 : i32
    return %arg0, %c0_i32 : i32, i32
  }
  func.func @transform_1(%arg0: i32) -> (i32, i32) {
    %c0_i32 = arith.constant 0 : i32
    %c0_i32_0 = arith.constant 0 : i32
    %c0_i32_1 = arith.constant 0 : i32
    return %c0_i32, %c0_i32_0 : i32, i32
  }
  func.func @transform_2(%arg0: i32) -> (i32, i32) {
    %c0_i32 = arith.constant 0 : i32
    %c0_i32_0 = arith.constant 0 : i32
    %c0_i32_1 = arith.constant 0 : i32
    return %c0_i32, %c0_i32_0 : i32, i32
  }
  func.func @transform_3(%arg0: i32) -> (i32, i32) {
    %c0_i32 = arith.constant 0 : i32
    %c0_i32_0 = arith.constant 0 : i32
    %c0_i32_1 = arith.constant 0 : i32
    return %c0_i32, %c0_i32_0 : i32, i32
  }
  func.func @transform_4(%arg0: i32) -> (i32, i32) {
    %c0_i32 = arith.constant 0 : i32
    %c0_i32_0 = arith.constant 0 : i32
    %c0_i32_1 = arith.constant 0 : i32
    return %c0_i32, %c0_i32_0 : i32, i32
  }
  func.func @transform_5(%arg0: i32) -> (i32, i32) {
    %c0_i32 = arith.constant 0 : i32
    %c0_i32_0 = arith.constant 0 : i32
    return %arg0, %c0_i32 : i32, i32
  }
}

</mosaic_0001>

<bundles_post_ra>
// kernel: position_wise_ffn.1
= control target key start
LH: loop header
LB: loop body
LE: loop exit
PB: predicated region body
PF: predicated region fallthrough
CT: control target
= control target key end

     0   :  { %10 = vsyncpa [#allocation3], 0  ;;  %s642_s0 = inlined_call_operand.vmem [shape: f32[16,32], index: 0, kind: input, shape index: {}]   ;;  %s643_s1 = inlined_call_operand.vmem [shape: f32[32,64], index: 1, kind: input, shape index: {}]   ;;  %s644_s2 = inlined_call_operand.vmem [shape: f32[1,64], index: 2, kind: input, shape index: {}]   ;;  %s645_s3 = inlined_call_operand.vmem [shape: f32[64,32], index: 3, kind: input, shape index: {}]   ;;  %s646_s4 = inlined_call_operand.vmem [shape: f32[1,32], index: 4, kind: input, shape index: {}]   ;;  %s647_s5 = inlined_call_operand.hbm [shape: f32[16,32], index: 5, kind: output, shape index: {}]  }
   0x1   :  { %12 = vsyncpa [#allocation3 + $0x1], 0  ;;  %s513_s18 = smov 0   ;;  %s515_s19 = smov 0  }
   0x2   :  { %s517_s20 = smov 0   ;;  %s519_s21 = smov 0  }
   0x3 LB: > { %s534_s22 = sadd.s32 4294967295, %s481_s21   ;;  %s366_s23 = sadd.s32 4294967294, %s481_s21   ;;  %s481_s21 = sphi %s519_s21, %s653_s21   ;;  %s477_s20 = sphi %s517_s20, %s652_s20   ;;  %s473_s19 = sphi %s515_s19, %s651_s19   ;;  %s469_s18 = sphi %s513_s18, %s650_s18  }
   0x4   : > { %s538_s24 = sadd.s32 1, %s481_s21   ;;  %s135_s25 = sadd.s32 1, %s477_s20 }
   0x5   : > { %s132_s26 = ssub.s32 %s481_s21, %s538_s24  ;;  %p145_p0 = scmp.ne.s32.totalorder %s477_s20, %s473_s19 }
   0x6   : > { %p133_p1 = scmp.eq.s32.totalorder %s132_s26, 0  ;;  %p146_p2 = scmp.eq.s32.totalorder %s534_s22, 1 }
   0x7   : > { %p151_p3 = scmp.ne.s32.totalorder %s473_s19, %s469_s18  ;;  %p152_p4 = scmp.eq.s32.totalorder %s366_s23, 1 }
   0x8   : > { %s549_s27 = scalar_select %p133_p1, %s477_s20, %s135_s25  }
   0x9   : > { %p551_p5 = por %p146_p2, %p145_p0  ;;  %p555_p6 = por %p152_p4, %p151_p3 }
   0xa   : > { %p369_p7 = scmp.ge.s32.totalorder %s481_s21, 1  ;;  %p189_p8 = scmp.lt.s32.totalorder %s481_s21, 3 }
   0xc   : > { %p190_p9 = pnand %p369_p7, %p189_p8 }
   0xd   : > { %p216_p10 = scmp.lt.s32.totalorder (!%p190_p9), %s534_s22, 1  ;;  %s375_s6 = sshll.u32 (!%p190_p9), %s534_s22, 3 }
   0xe   : > { %193 = sbr.rel (%p190_p9) target bundleno = 288 (0x120), region = 40  ;;  %s302_s9 = scalar_lea.hbm (!%p190_p9), %s647_s5, %s375_s6 }
   0xf   : > { %s306_s14 = sshll.u32 (!%p190_p9), %s302_s9, 4  ;;  %s439_s25 = scalar_lea.hbm (!%p190_p9), %s647_s5, 16  ;;  %s307_s14 = int_to_ptr.hbm [resolvable:$true] %s306_s14 }
  0x13   : > { %v224_v0 = vld [vmem:[%s643_s1 + $0x18] sm:$0xff]  ;;  %v223_v1 = vld [vmem:[%s643_s1 + $0x10] sm:$0xff]  ;;  %v222_v4 = vld [vmem:[%s643_s1 + $0x8] sm:$0xff]  ;;  %s217_s15 = scalar_select %p216_p10, %s534_s22, 1  ;;  %vm229_vm0 = vcmask 261120   ;;  %vm266_vm1 = vcmask 523264  }
  0x14   : > { %245 = vmatpush.msra.mxu0 %v224_v0  ;;  %v261_v2 = vld [vmem:[%s645_s3 + $0x38] sm:$0xff]  ;;  %v260_v3 = vld [vmem:[%s645_s3 + $0x30] sm:$0xff]  ;;  %v259_v5 = vld [vmem:[%s645_s3 + $0x28] sm:$0xff]  ;;  %s433_s22 = sshra.s32 %s307_s14, 4  ;;  %s434_s22 = int_to_ptr.hbm [resolvable:$true] %s433_s22 }
  0x15   : > { %278 = vmatpush.msra.mxu1 %v261_v2  ;;  %v221_v6 = vld [vmem:[%s643_s1] sm:$0xff]  ;;  %s371_s26 = sshll.u32 %s217_s15, 3  ;;  %v257_v9 = vld [vmem:[%s645_s3 + $0x18] sm:$0xff]  ;;  %v256_v10 = vld [vmem:[%s645_s3 + $0x10] sm:$0xff]  ;;  %s435_s16 = scalar_lea.hbm %s434_s22, 8 }
  0x16   : > { %246 = vmatpush.msra.mxu0 %v223_v1  ;;  %s219_s7 = scalar_lea.vmem %s642_s0, %s371_s26  ;;  %v258_v7 = vld [vmem:[%s645_s3 + $0x20] sm:$0xff]  ;;  %v255_v11 = vld [vmem:[%s645_s3 + $0x8] sm:$0xff]  ;;  %s213_s26 = sand.u32 1, %s473_s19  }
  0x17   : > { %279 = vmatpush.msra.mxu1 %v260_v3  ;;  %v220_v8 = vld [vmem:[%s219_s7] sm:$0xff]  ;;  %s370_s30 = sshll.u32 %s213_s26, 3  ;;  %s292_s15 = scalar_lea.sflag [#allocation3], %s213_s26 }
  0x18   : > { %247 = vmatpush.msra.mxu0 %v222_v4  ;;  %v254_v12 = vld [vmem:[%s645_s3] sm:$0xff]  ;;  %s215_s12 = scalar_lea.vmem [#allocation2], %s370_s30  ;;  %p436_p11 = scmp.ne.s32.totalorder %s434_s22, %s435_s16 }
  0x19   : > { %280 = vmatpush.msra.mxu1 %v259_v5  ;;  %v417_v13 = vld [vmem:[%s644_s2] ss:$0 sm:$0xff]  ;;  %s304_s13 = sshll.u32 %s215_s12, 4  ;;  %p440_p0 = scmp.lt.s32.totalorder %s434_s22, %s647_s5  ;;  %s305_s13 = int_to_ptr.vmem [resolvable:$true] %s304_s13 }
  0x1a   : > { %248 = vmatpush.msra.mxu0 %v221_v6  ;;  %v418_v17 = vld [vmem:[%s646_s4] ss:$0 sm:$0xff]  ;;  %p437_p12 = pnand %p436_p11, %p551_p5  ;;  %p441_p1 = scmp.lt.s32.totalorder %s439_s25, %s435_s16 }
  0x1b   : > { %372 = vmatmul.msk.f32.vlgmr.msra.gmra.mxu0 %vm229_vm0, %v220_v8  ;;  %281 = vmatpush.msra.mxu1 %v258_v7 }
  0x1c   : > { %p438_p13 = pneg %p437_p12  ;;  %p442_p2 = por %p441_p1, %p440_p0 }
  0x1d   : > { %282 = vmatpush.msra.mxu1 %v257_v9 }
  0x1e   : > { %p443_p3 = pnand %p442_p2, %p438_p13 }
  0x1f   : > { %283 = vmatpush.msra.mxu1 %v256_v10 }
  0x21   : > { %284 = vmatpush.msra.mxu1 %v255_v11 }
  0x23   : > { %285 = vmatpush.msra.mxu1 %v254_v12 }
  0x98   : > { %v250_v14 = vpop.f32.mrf.mxu0 }
  0x99   : > { %v251_v15 = vadd.f32 %v417_v13, %v250_v14 }
  0x9b   : > { %v253_v16 = vmax.f32 %v251_v15, 0.0 }
  0x9d   : > { %373 = vmatmul.msk.f32.vlgmr.msra.gmra.mxu1 %vm266_vm1, %v253_v16 }
 0x11a   : > { %v287_v18 = vpop.f32.mrf.mxu1 }
 0x11b   : > { %v288_v19 = vadd.f32 %v418_v17, %v287_v18 }
 0x11d   : > { %290 = vst.msk [vmem:[%s215_s12] sm:$0xff] %vm229_vm0, %v288_v19 }
 0x11e   : > { %446 = shalt.err (!%p443_p3)
}
 0x11f   : > { %378 = dma.vmem_to_hbm [thread:$0]  (%p551_p5), %s305_s13, 128, %s307_s14, %s292_s15  }
 0x120 PF: > { %p384_p4 = scmp.ge.s32.totalorder %s481_s21, 2  ;;  %s318_s26 = sand.u32 1, %s469_s18  }
 0x121   : > { %s319_s7 = scalar_lea.sflag [#allocation3], %s318_s26 }
 0x122   : > { %p381_p7 = pnand %p384_p4, %p555_p6 }
 0x124   : > { %p382_p8 = pneg %p381_p7 }
 0x126   : > { %464 = dma.done.wait (%p382_p8), %s319_s7, 128  }
 0x127   : > { %466 = vsyncadd (%p382_p8), %s319_s7, 4294967168  ;;  %p15_p9 = scmp.ge.s32.totalorder %s538_s24, 4   ;;  %s650_s18 = smov %s473_s19 }
 0x128   : > { %s651_s19 = smov %s477_s20  ;;  %s652_s20 = smov %s549_s27 }
 0x129   : > { %s653_s21 = smov %s538_s24  ;;  %17 = sbr.rel (!%p15_p9) target bundleno = 3 (0x3), region = 75 }
 0x12e   :  { %325 = vsyncpa [#allocation3], 1 }
 0x12f   :  { %327 = vsyncpa [#allocation3 + $0x1], 1 }

</bundles_post_ra>
